<compile_context>
chip_gen: v5e
topology: v5e:2x2
jax: 0.10.0
libtpu: 0.0.40
codegen_flags: <defaults>
</compile_context>

<pallas_src>
import jax
import jax.numpy as jnp
from jax.experimental import pallas as pl
from jax.experimental.pallas import tpu as pltpu


def _round_up(x, m):
    return ((x + m - 1) // m) * m


def _pick_hh_tile(hidden_half, target):
    """Largest hidden//2 chunk <= target that is a multiple of 128 and divides hidden_half."""
    if hidden_half <= target:
        return hidden_half
    t = (target // 128) * 128
    while t >= 128:
        if hidden_half % t == 0:
            return t
        t -= 128
    return hidden_half  # no aligned divisor: keep it fully resident (single k step)


def glu_mlp_kernel(x_ref, w1a_ref, w1b_ref, b1a_ref, b1b_ref, w2_ref, b2_ref,
                   o_ref, acc_ref):
    """K-tiled variant: grid = (row_tiles, k_tiles), accumulates fc2 in f32 scratch."""
    k = pl.program_id(1)
    nk = pl.num_programs(1)

    @pl.when(k == 0)
    def _():
        # Seed the accumulator with the fc2 bias so the finalize step is just a cast.
        acc_ref[...] = jnp.broadcast_to(b2_ref[...], acc_ref.shape)

    x = x_ref[...]

    # fc1, split into value path and gate path (no lane-axis slicing of a wide h).
    h_val = jnp.dot(x, w1a_ref[...], preferred_element_type=jnp.float32) + b1a_ref[...]
    h_gate = jnp.dot(x, w1b_ref[...], preferred_element_type=jnp.float32) + b1b_ref[...]

    # GLU gating in f32 on the VPU/EUP.
    g = h_val * jax.nn.sigmoid(h_gate)

    # drop1: p = 0.0 -> identity

    # fc2 partial product for this hidden chunk, accumulated in f32.
    acc_ref[...] += jnp.dot(g.astype(w2_ref.dtype), w2_ref[...],
                            preferred_element_type=jnp.float32)

    @pl.when(k == nk - 1)
    def _():
        # drop2: p = 0.0 -> identity
        o_ref[...] = acc_ref[...].astype(o_ref.dtype)


def glu_mlp_kernel_single(x_ref, w1a_ref, w1b_ref, b1a_ref, b1b_ref, w2_ref, b2_ref,
                          o_ref):
    """Single-step variant (whole hidden//2 resident): no scratch accumulator needed."""
    x = x_ref[...]
    h_val = jnp.dot(x, w1a_ref[...], preferred_element_type=jnp.float32) + b1a_ref[...]
    h_gate = jnp.dot(x, w1b_ref[...], preferred_element_type=jnp.float32) + b1b_ref[...]
    g = h_val * jax.nn.sigmoid(h_gate)
    y = jnp.dot(g.astype(w2_ref.dtype), w2_ref[...],
                preferred_element_type=jnp.float32) + b2_ref[...]
    o_ref[...] = y.astype(o_ref.dtype)


def glu_mlp(x, w1, b1, w2, b2, *, row_tile=256, hh_tile_target=512,
            compute_dtype=jnp.bfloat16):
    """x: (..., in); w1: (in, hidden); b1: (hidden,); w2: (hidden//2, out); b2: (out,)."""
    in_features = x.shape[-1]
    lead_shape = x.shape[:-1]
    x2 = x.reshape(-1, in_features)
    N = x2.shape[0]

    hidden = w1.shape[1]
    out_features = w2.shape[1]
    assert hidden % 2 == 0
    hidden_half = hidden // 2
    assert w2.shape[0] == hidden_half

    out_dtype = x.dtype

    # ---- row tiling (pad N up to a multiple of the row tile) ----
    row_tile = max(8, min(int(row_tile), _round_up(N, 8)))
    row_tile = _round_up(row_tile, 8)
    n_pad = _round_up(N, row_tile)
    if n_pad != N:
        x2 = jnp.pad(x2, ((0, n_pad - N), (0, 0)))

    # ---- hidden//2 (fc2-K) tiling ----
    hh_tile = _pick_hh_tile(hidden_half, hh_tile_target)
    num_k = hidden_half // hh_tile

    # ---- split fc1 into value / gate halves on the host ----
    w1a = w1[:, :hidden_half].astype(compute_dtype)
    w1b = w1[:, hidden_half:].astype(compute_dtype)
    b1a = b1[:hidden_half].reshape(1, hidden_half).astype(jnp.float32)
    b1b = b1[hidden_half:].reshape(1, hidden_half).astype(jnp.float32)
    w2c = w2.astype(compute_dtype)
    b2_2d = b2.reshape(1, out_features).astype(jnp.float32)
    xc = x2.astype(compute_dtype)

    # ---- VMEM budget hint (double-buffered blocks + f32 accumulator + headroom) ----
    bpe = jnp.dtype(compute_dtype).itemsize
    obe = jnp.dtype(out_dtype).itemsize
    ws = 2 * (row_tile * in_features * bpe            # x tile
              + 2 * in_features * hh_tile * bpe       # W1a + W1b chunks
              + hh_tile * out_features * bpe          # W2 chunk
              + (2 * hh_tile + out_features) * 4      # biases (f32)
              + row_tile * out_features * obe)        # output tile
    ws += row_tile * out_features * 4                 # accumulator scratch
    vmem_limit = int(min(max(ws + (8 << 20), 32 << 20), 56 << 20))

    if num_k == 1:
        grid = (n_pad // row_tile,)
        grid_spec = pltpu.PrefetchScalarGridSpec(
            num_scalar_prefetch=0,
            grid=grid,
            in_specs=[
                pl.BlockSpec((row_tile, in_features), lambda i: (i, 0)),       # x tile
                pl.BlockSpec((in_features, hh_tile), lambda i: (0, 0)),        # W1 value half
                pl.BlockSpec((in_features, hh_tile), lambda i: (0, 0)),        # W1 gate half
                pl.BlockSpec((1, hh_tile), lambda i: (0, 0)),                  # b1 value half
                pl.BlockSpec((1, hh_tile), lambda i: (0, 0)),                  # b1 gate half
                pl.BlockSpec((hh_tile, out_features), lambda i: (0, 0)),       # W2
                pl.BlockSpec((1, out_features), lambda i: (0, 0)),             # b2
            ],
            out_specs=pl.BlockSpec((row_tile, out_features), lambda i: (i, 0)),
        )
        kernel = glu_mlp_kernel_single
        dim_sem = ("parallel",)
    else:
        grid = (n_pad // row_tile, num_k)
        grid_spec = pltpu.PrefetchScalarGridSpec(
            num_scalar_prefetch=0,
            grid=grid,
            in_specs=[
                pl.BlockSpec((row_tile, in_features), lambda i, k: (i, 0)),    # x tile
                pl.BlockSpec((in_features, hh_tile), lambda i, k: (0, k)),     # W1 value half
                pl.BlockSpec((in_features, hh_tile), lambda i, k: (0, k)),     # W1 gate half
                pl.BlockSpec((1, hh_tile), lambda i, k: (0, k)),               # b1 value half
                pl.BlockSpec((1, hh_tile), lambda i, k: (0, k)),               # b1 gate half
                pl.BlockSpec((hh_tile, out_features), lambda i, k: (k, 0)),    # W2 chunk
                pl.BlockSpec((1, out_features), lambda i, k: (0, 0)),          # b2
            ],
            out_specs=pl.BlockSpec((row_tile, out_features), lambda i, k: (i, 0)),
            scratch_shapes=[pltpu.VMEM((row_tile, out_features), jnp.float32)],
        )
        kernel = glu_mlp_kernel
        dim_sem = ("parallel", "arbitrary")

    out = pl.pallas_call(
        kernel,
        out_shape=jax.ShapeDtypeStruct((n_pad, out_features), out_dtype),
        grid_spec=grid_spec,
        compiler_params=pltpu.CompilerParams(
            dimension_semantics=dim_sem,
            vmem_limit_bytes=vmem_limit,
        ),
    )(xc, w1a, w1b, b1a, b1b, w2c, b2_2d)

    out = out[:N] if n_pad != N else out
    return out.reshape(*lead_shape, out_features)


def glu_mlp_ref(x, w1, b1, w2, b2):
    h = x @ w1 + b1
    half = h.shape[-1] // 2
    g = h[..., :half] * jax.nn.sigmoid(h[..., half:])
    return g @ w2 + b2


if __name__ == "__main__":
    # Small shapes consistent with the module: batch=2, seq=8, in=32,
    # hidden=64 (must be even), out=32.
    batch, seq = 2, 8
    in_features = 32
    hidden_features = 64
    out_features = 32
    N = batch * seq

    key = jax.random.PRNGKey(0)
    kx, kw1, kb1, kw2, kb2 = jax.random.split(key, 5)

    x = jax.random.normal(kx, (N, in_features), dtype=jnp.float32)

    # Deterministic synthetic parameters (nn.Linear weights pre-transposed to (in, out)).
    w1 = jax.random.normal(kw1, (in_features, hidden_features), dtype=jnp.float32) * 0.05
    b1 = jax.random.normal(kb1, (hidden_features,), dtype=jnp.float32) * 0.05
    w2 = jax.random.normal(kw2, (hidden_features // 2, out_features), dtype=jnp.float32) * 0.05
    b2 = jax.random.normal(kb2, (out_features,), dtype=jnp.float32) * 0.05

    ref = glu_mlp_ref(x, w1, b1, w2, b2)

    # Exact-precision path (f32 on the MXU): strict check against the reference.
    out_f32 = jax.block_until_ready(
        glu_mlp(x, w1, b1, w2, b2, compute_dtype=jnp.float32))
    assert out_f32.shape == (N, out_features)
    assert jnp.allclose(out_f32, ref, atol=1e-5, rtol=1e-5), "f32 path mismatch vs reference"

    # Fast path (bf16 MXU inputs, f32 accumulation and gating): relaxed tolerance.
    out_bf16 = jax.block_until_ready(
        glu_mlp(x, w1, b1, w2, b2, compute_dtype=jnp.bfloat16))
    assert out_bf16.shape == (N, out_features)
    assert jnp.allclose(out_bf16, ref, atol=3e-2, rtol=3e-2), "bf16 path mismatch vs reference"

    # Also exercise the K-tiled accumulator path (forces multiple k steps).
    out_ktiled = jax.block_until_ready(
        glu_mlp(x, w1, b1, w2, b2, compute_dtype=jnp.float32, hh_tile_target=16))
    assert jnp.allclose(out_ktiled, ref, atol=1e-5, rtol=1e-5), "k-tiled path mismatch"

    print("KERNEL_OK")
</pallas_src>

<mosaic_0001>
module attributes {stable_mosaic.version = 11 : i64} {
  func.func @glu_mlp_kernel_single(%arg0: i32, %arg1: memref<16x32xf32, #tpu.memory_space<vmem>>, %arg2: memref<32x32xf32, #tpu.memory_space<vmem>>, %arg3: memref<32x32xf32, #tpu.memory_space<vmem>>, %arg4: memref<1x32xf32, #tpu.memory_space<vmem>>, %arg5: memref<1x32xf32, #tpu.memory_space<vmem>>, %arg6: memref<32x32xf32, #tpu.memory_space<vmem>>, %arg7: memref<1x32xf32, #tpu.memory_space<vmem>>, %arg8: memref<16x32xf32, #tpu.memory_space<vmem>>) attributes {dimension_semantics = [#tpu.dimension_semantics<parallel>], iteration_bounds = array<i64: 1>, scalar_prefetch = 0 : i64, scratch_operands = 0 : i64, tpu.core_type = #tpu.core_type<tc>, window_params = [{transform_indices = @transform_0, window_bounds = array<i64: 16, 32>}, {pipeline_mode = #tpu.pipeline_mode<synchronous>, transform_indices = @transform_1, window_bounds = array<i64: 32, 32>}, {pipeline_mode = #tpu.pipeline_mode<synchronous>, transform_indices = @transform_2, window_bounds = array<i64: 32, 32>}, {pipeline_mode = #tpu.pipeline_mode<synchronous>, transform_indices = @transform_3, window_bounds = array<i64: 1, 32>}, {pipeline_mode = #tpu.pipeline_mode<synchronous>, transform_indices = @transform_4, window_bounds = array<i64: 1, 32>}, {pipeline_mode = #tpu.pipeline_mode<synchronous>, transform_indices = @transform_5, window_bounds = array<i64: 32, 32>}, {pipeline_mode = #tpu.pipeline_mode<synchronous>, transform_indices = @transform_6, window_bounds = array<i64: 1, 32>}, {transform_indices = @transform_7, window_bounds = array<i64: 16, 32>}]} {
    %c0 = arith.constant 0 : index
    %c0_0 = arith.constant 0 : index
    %0 = vector.load %arg1[%c0, %c0_0] : memref<16x32xf32, #tpu.memory_space<vmem>>, vector<16x32xf32>
    %c0_1 = arith.constant 0 : index
    %c0_2 = arith.constant 0 : index
    %1 = vector.load %arg2[%c0_1, %c0_2] : memref<32x32xf32, #tpu.memory_space<vmem>>, vector<32x32xf32>
    %cst = arith.constant dense<0.000000e+00> : vector<16x32xf32>
    %2 = tpu.matmul %0, %1, %cst {dimension_numbers = #tpu.dot_dimension_numbers<[1], [0], [0], [1], [0, 0, 1, 1], [], []>} : vector<16x32xf32>, vector<32x32xf32>, vector<16x32xf32> -> vector<16x32xf32>
    %c0_3 = arith.constant 0 : index
    %c0_4 = arith.constant 0 : index
    %3 = vector.load %arg4[%c0_3, %c0_4] : memref<1x32xf32, #tpu.memory_space<vmem>>, vector<1x32xf32>
    %4 = vector.broadcast %3 : vector<1x32xf32> to vector<16x32xf32>
    %5 = arith.addf %2, %4 : vector<16x32xf32>
    %c0_5 = arith.constant 0 : index
    %c0_6 = arith.constant 0 : index
    %6 = vector.load %arg3[%c0_5, %c0_6] : memref<32x32xf32, #tpu.memory_space<vmem>>, vector<32x32xf32>
    %cst_7 = arith.constant dense<0.000000e+00> : vector<16x32xf32>
    %7 = tpu.matmul %0, %6, %cst_7 {dimension_numbers = #tpu.dot_dimension_numbers<[1], [0], [0], [1], [0, 0, 1, 1], [], []>} : vector<16x32xf32>, vector<32x32xf32>, vector<16x32xf32> -> vector<16x32xf32>
    %c0_8 = arith.constant 0 : index
    %c0_9 = arith.constant 0 : index
    %8 = vector.load %arg5[%c0_8, %c0_9] : memref<1x32xf32, #tpu.memory_space<vmem>>, vector<1x32xf32>
    %9 = vector.broadcast %8 : vector<1x32xf32> to vector<16x32xf32>
    %10 = arith.addf %7, %9 : vector<16x32xf32>
    %11 = arith.negf %10 : vector<16x32xf32>
    %12 = math.exp %11 : vector<16x32xf32>
    %cst_10 = arith.constant 1.000000e+00 : f32
    %13 = vector.broadcast %cst_10 : f32 to vector<16x32xf32>
    %14 = arith.addf %13, %12 : vector<16x32xf32>
    %15 = arith.divf %13, %14 : vector<16x32xf32>
    %16 = arith.mulf %5, %15 : vector<16x32xf32>
    %c0_11 = arith.constant 0 : index
    %c0_12 = arith.constant 0 : index
    %17 = vector.load %arg6[%c0_11, %c0_12] : memref<32x32xf32, #tpu.memory_space<vmem>>, vector<32x32xf32>
    %cst_13 = arith.constant dense<0.000000e+00> : vector<16x32xf32>
    %18 = tpu.matmul %16, %17, %cst_13 {dimension_numbers = #tpu.dot_dimension_numbers<[1], [0], [0], [1], [0, 0, 1, 1], [], []>} : vector<16x32xf32>, vector<32x32xf32>, vector<16x32xf32> -> vector<16x32xf32>
    %c0_14 = arith.constant 0 : index
    %c0_15 = arith.constant 0 : index
    %19 = vector.load %arg7[%c0_14, %c0_15] : memref<1x32xf32, #tpu.memory_space<vmem>>, vector<1x32xf32>
    %20 = vector.broadcast %19 : vector<1x32xf32> to vector<16x32xf32>
    %21 = arith.addf %18, %20 : vector<16x32xf32>
    %c0_16 = arith.constant 0 : index
    %c0_17 = arith.constant 0 : index
    %22 = vector.load %arg8[%c0_16, %c0_17] : memref<16x32xf32, #tpu.memory_space<vmem>>, vector<16x32xf32>
    tpu.vector_store %arg8[%c0_16, %c0_17], %21 {strides = array<i32>} : memref<16x32xf32, #tpu.memory_space<vmem>>, vector<16x32xf32>,
    return
  }
  func.func @transform_0(%arg0: i32) -> (i32, i32) {
    %c0_i32 = arith.constant 0 : i32
    %c0_i32_0 = arith.constant 0 : i32
    return %arg0, %c0_i32 : i32, i32
  }
  func.func @transform_1(%arg0: i32) -> (i32, i32) {
    %c0_i32 = arith.constant 0 : i32
    %c0_i32_0 = arith.constant 0 : i32
    %c0_i32_1 = arith.constant 0 : i32
    return %c0_i32, %c0_i32_0 : i32, i32
  }
  func.func @transform_2(%arg0: i32) -> (i32, i32) {
    %c0_i32 = arith.constant 0 : i32
    %c0_i32_0 = arith.constant 0 : i32
    %c0_i32_1 = arith.constant 0 : i32
    return %c0_i32, %c0_i32_0 : i32, i32
  }
  func.func @transform_3(%arg0: i32) -> (i32, i32) {
    %c0_i32 = arith.constant 0 : i32
    %c0_i32_0 = arith.constant 0 : i32
    %c0_i32_1 = arith.constant 0 : i32
    return %c0_i32, %c0_i32_0 : i32, i32
  }
  func.func @transform_4(%arg0: i32) -> (i32, i32) {
    %c0_i32 = arith.constant 0 : i32
    %c0_i32_0 = arith.constant 0 : i32
    %c0_i32_1 = arith.constant 0 : i32
    return %c0_i32, %c0_i32_0 : i32, i32
  }
  func.func @transform_5(%arg0: i32) -> (i32, i32) {
    %c0_i32 = arith.constant 0 : i32
    %c0_i32_0 = arith.constant 0 : i32
    %c0_i32_1 = arith.constant 0 : i32
    return %c0_i32, %c0_i32_0 : i32, i32
  }
  func.func @transform_6(%arg0: i32) -> (i32, i32) {
    %c0_i32 = arith.constant 0 : i32
    %c0_i32_0 = arith.constant 0 : i32
    %c0_i32_1 = arith.constant 0 : i32
    return %c0_i32, %c0_i32_0 : i32, i32
  }
  func.func @transform_7(%arg0: i32) -> (i32, i32) {
    %c0_i32 = arith.constant 0 : i32
    %c0_i32_0 = arith.constant 0 : i32
    return %arg0, %c0_i32 : i32, i32
  }
}

</mosaic_0001>

<bundles_post_ra>
// kernel: tpu_custom_call.1
= control target key start
LH: loop header
LB: loop body
LE: loop exit
PB: predicated region body
PF: predicated region fallthrough
CT: control target
= control target key end

     0   :  { %12 = vsyncpa [#allocation3], 0  ;;  %s513_s0 = inlined_call_operand.hbm [shape: f32[16,32], index: 0, kind: input, shape index: {}]   ;;  %s514_s1 = inlined_call_operand.hbm [shape: f32[32,32], index: 1, kind: input, shape index: {}]   ;;  %s515_s2 = inlined_call_operand.hbm [shape: f32[32,32], index: 2, kind: input, shape index: {}]   ;;  %s516_s3 = inlined_call_operand.vmem [shape: f32[1,32], index: 3, kind: input, shape index: {}]   ;;  %s517_s4 = inlined_call_operand.vmem [shape: f32[1,32], index: 4, kind: input, shape index: {}]   ;;  %s518_s5 = inlined_call_operand.hbm [shape: f32[32,32], index: 5, kind: input, shape index: {}]   ;;  %s519_s6 = inlined_call_operand.vmem [shape: f32[1,32], index: 6, kind: input, shape index: {}]   ;;  %s520_s7 = inlined_call_operand.hbm [shape: f32[16,32], index: 7, kind: output, shape index: {}]  }
   0x1   :  { %13 = vsyncpa [#allocation6], 0 }
   0x2   :  { %14 = vsyncpa [#allocation9], 0 }
   0x3   :  { %15 = vsyncpa [#allocation4], 0  ;;  %s33_s26 = sshll.u32 %s514_s1, 4  ;;  %s419_s27 = smov [#allocation5]   ;;  %s34_s26 = int_to_ptr.hbm [resolvable:$true] %s33_s26 }
   0x4   :  { %s35_s28 = sshll.u32 %s419_s27, 4  ;;  %s20_s8 = sshll.u32 %s513_s0, 4  ;;  %s36_s28 = int_to_ptr.vmem [resolvable:$true] %s35_s28  ;;  %s21_s8 = int_to_ptr.hbm [resolvable:$true] %s20_s8 }
   0x5   :  { %s420_s9 = smov 128   ;;  %s421_s10 = smov 8  }
   0x6   :  { %41 = dma.hbm_to_vmem [thread:$0]  %s34_s26, 512, %s36_s28, [#allocation6], %s420_s9, %s420_s9, %s421_s10  }
   0x7   :  { %s422_s11 = smov [#allocation2]   ;;  %s46_s1 = sshll.u32 %s515_s2, 4  ;;  %s47_s1 = int_to_ptr.hbm [resolvable:$true] %s46_s1 }
   0x8   :  { %s22_s12 = sshll.u32 %s422_s11, 4  ;;  %s63_s16 = sshll.u32 %s518_s5, 4  ;;  %s23_s12 = int_to_ptr.vmem [resolvable:$true] %s22_s12  ;;  %s64_s16 = int_to_ptr.hbm [resolvable:$true] %s63_s16 }
   0x9   :  { %28 = dma.hbm_to_vmem [thread:$0]  %s21_s8, 256, %s23_s12, [#allocation3], %s420_s9, %s420_s9, %s421_s10  }
   0xa   :  { %s423_s17 = smov [#allocation7]   ;;  %s424_s19 = smov [#allocation8]  }
   0xb   :  { %s48_s18 = sshll.u32 %s423_s17, 4  ;;  %s65_s2 = sshll.u32 %s424_s19, 4  ;;  %s49_s18 = int_to_ptr.vmem [resolvable:$true] %s48_s18  ;;  %s66_s2 = int_to_ptr.vmem [resolvable:$true] %s65_s2 }
   0xc   :  { %54 = dma.hbm_to_vmem [thread:$0]  %s47_s1, 512, %s49_s18, [#allocation6], %s420_s9, %s420_s9, %s421_s10  }
   0xd   :  { %71 = dma.hbm_to_vmem [thread:$0]  %s64_s16, 512, %s66_s2, [#allocation9], %s420_s9, %s420_s9, %s421_s10  }
   0xe   :  { %411 = dma.done.wait [#allocation3], 256  }
   0xf   :  { %412 = vsyncadd [#allocation3], 4294967040 }
  0x10   :  { %413 = dma.done.wait [#allocation6], 1024  }
  0x11   :  { %414 = vsyncadd [#allocation6], 4294966272 }
  0x12   :  { %415 = dma.done.wait [#allocation9], 512  }
  0x13   :  { %416 = vsyncadd [#allocation9], 4294966784  ;;  %v133_v0 = vld [vmem:[#allocation7 + $0x18] sm:$0xff]  ;;  %v132_v1 = vld [vmem:[#allocation7 + $0x10] sm:$0xff]  ;;  %vm100_vm0 = vcmask 261120   ;;  %s425_s23 = smov [#allocation10]  }
  0x14   :  { %150 = vmatpush.msra.mxu1 %v133_v0  ;;  %v131_v2 = vld [vmem:[#allocation7 + $0x8] sm:$0xff]  ;;  %v95_v3 = vld [vmem:[#allocation5 + $0x18] sm:$0xff]  ;;  %v94_v4 = vld [vmem:[#allocation5 + $0x10] sm:$0xff]  ;;  %s244_s24 = sshll.u32 %s425_s23, 4  ;;  %s246_s27 = sshll.u32 %s520_s7, 4  ;;  %s245_s24 = int_to_ptr.vmem [resolvable:$true] %s244_s24  ;;  %s247_s27 = int_to_ptr.hbm [resolvable:$true] %s246_s27 }
  0x15   :  { %v130_v5 = vld [vmem:[#allocation7] sm:$0xff]  ;;  %119 = vmatpush.msra.mxu0 %v95_v3  ;;  %269 = vmatpush.msra.mxu3 %v95_v3  ;;  %v93_v6 = vld [vmem:[#allocation5 + $0x8] sm:$0xff]  ;;  %v90_v7 = vld [vmem:[#allocation2] sm:$0xff] }
  0x16   :  { %151 = vmatpush.msra.mxu1 %v132_v1  ;;  %v92_v8 = vld [vmem:[#allocation5] sm:$0xff]  ;;  %v91_v9 = vld [vmem:[#allocation2 + $0x8] sm:$0xff]  ;;  %v203_v11 = vld [vmem:[#allocation8 + $0x10] sm:$0xff] }
  0x17   :  { %120 = vmatpush.msra.mxu0 %v94_v4  ;;  %270 = vmatpush.msra.mxu3 %v94_v4  ;;  %v204_v10 = vld [vmem:[#allocation8 + $0x18] sm:$0xff]  ;;  %v280_v12 = vld [vmem:[%s517_s4] ss:$0 sm:$0xff]  ;;  %v202_v13 = vld [vmem:[#allocation8 + $0x8] sm:$0xff] }
  0x18   :  { %152 = vmatpush.msra.mxu1 %v131_v2  ;;  %227 = vmatpush.msra.mxu2 %v204_v10  ;;  %v201_v14 = vld [vmem:[#allocation8] sm:$0xff]  ;;  %v281_v27 = vld [vmem:[%s516_s3] ss:$0 sm:$0xff] }
  0x19   :  { %121 = vmatpush.msra.mxu0 %v93_v6  ;;  %271 = vmatpush.msra.mxu3 %v93_v6  ;;  %v282_v52 = vld [vmem:[%s519_s6] ss:$0 sm:$0xff] }
  0x1a   :  { %153 = vmatpush.msra.mxu1 %v130_v5  ;;  %228 = vmatpush.msra.mxu2 %v203_v11 }
  0x1b   :  { %263 = vmatmul.msk.f32.vlgmr.msra.gmra.mxu1 %vm100_vm0, %v90_v7  ;;  %122 = vmatpush.msra.mxu0 %v92_v8 }
  0x1c   :  { %261 = vmatmul.msk.f32.vlgmr.msra.gmra.mxu0 %vm100_vm0, %v90_v7  ;;  %272 = vmatpush.msra.mxu3 %v92_v8 }
  0x1d   :  { %262 = vmatmul.msk.f32.vlgmr.msra.gmra.mxu3 %vm100_vm0, %v91_v9  ;;  %229 = vmatpush.msra.mxu2 %v202_v13 }
  0x1f   :  { %230 = vmatpush.msra.mxu2 %v201_v14 }
  0x23   :  { %264 = vmatmul.msk.f32.gmra.mxu1 %vm100_vm0, %v91_v9 }
  0x98   :  { %v155_v15 = vpop.f32.mrf.mxu1 }
  0x99   :  { %v156_v16 = vadd.f32 %v280_v12, %v155_v15  ;;  %v124_v29 = vpop.f32.mrf.mxu0 }
  0x9a   :  { %v125_v33 = vadd.f32 %v281_v27, %v124_v29 }
  0x9b   :  { %v265_v17 = vmul.f32 -1.442695, %v156_v16 }
  0x9d   :  { %283 = vpow2.f32 %v265_v17 }
  0xa0   :  { %v158_v18 = vpop.f32.mrf.mxu1  ;;  %v127_v42 = vpop.f32.mrf.mxu3 }
  0xa1   :  { %v159_v19 = vadd.f32 %v280_v12, %v158_v18  ;;  %v128_v46 = vadd.f32 %v281_v27, %v127_v42 }
  0xa3   :  { %v284_v20 = vpop.eup %283  ;;  %v266_v21 = vmul.f32 -1.442695, %v159_v19 }
  0xa4   :  { %v167_v22 = vadd.f32 1.0, %v284_v20 }
  0xa5   :  { %285 = vpow2.f32 %v266_v21 }
  0xa6   :  { %287 = vrcp.f32 %v167_v22  ;;  %v180_v30 = vand.u32 2147483648, %v167_v22  ;;  %v178_v32 = vand.u32 2147483647, %v167_v22  ;;  %vm174_vm2 = vweird.f32 %v167_v22 }
  0xa8   :  { %v181_v36 = vor.u32 1.1754944e-38, %v180_v30  ;;  %vm179_vm4 = vcmp.eq.f32.partialorder %v178_v32, 8.507059e+37 }
  0xab   :  { %v286_v23 = vpop.eup %285 }
  0xac   :  { %v288_v24 = vpop.eup %287  ;;  %v168_v25 = vadd.f32 1.0, %v286_v23 }
  0xad   :  { %v170_v26 = vmul.f32 %v288_v24, %v167_v22  ;;  %vm175_vm1 = vweird.f32 %v288_v24 }
  0xae   :  { %289 = vrcp.f32 %v168_v25  ;;  %vm176_vm3 = vmor %vm174_vm2, %vm175_vm1  ;;  %v195_v43 = vand.u32 2147483648, %v168_v25  ;;  %v193_v45 = vand.u32 2147483647, %v168_v25  ;;  %vm189_vm6 = vweird.f32 %v168_v25 }
  0xaf   :  { %v171_v28 = vsub.f32 1.0, %v170_v26 }
  0xb0   :  { %v196_v48 = vor.u32 1.1754944e-38, %v195_v43  ;;  %vm194_vm8 = vcmp.eq.f32.partialorder %v193_v45, 8.507059e+37 }
  0xb1   :  { %v172_v31 = vmul.f32 %v288_v24, %v171_v28 }
  0xb3   :  { %v173_v34 = vadd.f32 %v288_v24, %v172_v31 }
  0xb4   :  { %v290_v35 = vpop.eup %289 }
  0xb5   :  { %v177_v37 = vsel %vm176_vm3, %v288_v24, %v173_v34  ;;  %v185_v38 = vmul.f32 %v290_v35, %v168_v25  ;;  %vm190_vm5 = vweird.f32 %v290_v35 }
  0xb6   :  { %v182_v39 = vsel %vm179_vm4, %v181_v36, %v177_v37  ;;  %vm191_vm7 = vmor %vm189_vm6, %vm190_vm5 }
  0xb7   :  { %v199_v40 = vmul.f32 %v182_v39, %v125_v33  ;;  %v186_v41 = vsub.f32 1.0, %v185_v38 }
  0xb9   :  { %267 = vmatmul.msk.f32.vlgmr.msra.gmra.mxu2 %vm100_vm0, %v199_v40  ;;  %v187_v44 = vmul.f32 %v290_v35, %v186_v41 }
  0xbb   :  { %v188_v47 = vadd.f32 %v290_v35, %v187_v44 }
  0xbd   :  { %v192_v49 = vsel %vm191_vm7, %v290_v35, %v188_v47 }
  0xbe   :  { %v197_v50 = vsel %vm194_vm8, %v196_v48, %v192_v49 }
  0xbf   :  { %v200_v51 = vmul.f32 %v197_v50, %v128_v46 }
  0xc1   :  { %268 = vmatmul.msk.f32.gmra.mxu2 %vm100_vm0, %v200_v51 }
 0x13c   :  { %v232_v53 = vpop.f32.mrf.mxu2 }
 0x13d   :  { %v233_v54 = vadd.f32 %v282_v52, %v232_v53 }
 0x13f   :  { %238 = vst.msk [vmem:[#allocation10] sm:$0xff] %vm100_vm0, %v233_v54 }
 0x144   :  { %v235_v55 = vpop.f32.mrf.mxu2 }
 0x145   :  { %v236_v56 = vadd.f32 %v282_v52, %v235_v55 }
 0x147   :  { %239 = vst.msk [vmem:[#allocation10 + $0x8] sm:$0xff] %vm100_vm0, %v236_v56 }
 0x148   :  { %252 = dma.vmem_to_hbm [thread:$0]  %s245_s24, 256, %s247_s27, [#allocation4], %s420_s9, %s420_s9, %s421_s10  }
 0x149   :  { %417 = dma.done.wait [#allocation4], 256  }
 0x14a   :  { %418 = vsyncadd [#allocation4], 4294967040 }
 0x14b   :  { %257 = vsyncpa [#allocation3], 1 }
 0x14c   :  { %258 = vsyncpa [#allocation6], 1 }
 0x14d   :  { %259 = vsyncpa [#allocation9], 1 }
 0x14e   :  { %260 = vsyncpa [#allocation4], 1 }

</bundles_post_ra>
